<compile_context>
chip_gen: v5e
topology: v5e:2x2
jax: 0.10.0
libtpu: 0.0.40
codegen_flags: <defaults>
</compile_context>

<pallas_src>
import math
from functools import partial

import jax
import jax.numpy as jnp
from jax import lax
from jax.experimental import pallas as pl
from jax.experimental.pallas import tpu as pltpu

# TODO(synk): `replace_denormals` is referenced but not defined in the source
# snippet; threshold 1e-5 is the standard value in that codebase family.
_DENORM_TH = 1e-5


def _replace_denormals(v, th=_DENORM_TH):
    return jnp.where((v < th) & (v > -th), jnp.full_like(v, th), v)


def _round_up(x, m):
    return ((x + m - 1) // m) * m


def _swin_cc_kernel(w0_ref, x_ref, fwd_ref, mvar_ref, inv_ref, beta_ref, o_ref,
                    *, C, eps, inv_sqrt2, denorm_th):
    x = x_ref[...]                                   # (TM, L) f32, L = G*C
    L = x.shape[-1]
    w0 = w0_ref[0]

    # Forward real DFT of every packed row-group in ONE MXU matmul:
    #   fwd = [blockdiag(cos) | blockdiag(-sin)]  ->  xf = [X_re | X_im]
    xf = jnp.dot(x, fwd_ref[...], preferred_element_type=jnp.float32)   # (TM, 2L)
    x_re = xf[:, :L]
    x_im = xf[:, L:]

    # lane-local bin index; DC (k == 0) mask per packed group
    lane = lax.broadcasted_iota(jnp.int32, (1, L), 1)
    is_dc = (lane % C) == 0

    # FFT(x - mean) == FFT(x) with the DC bin zeroed (mean subtraction in freq
    # domain; X_im at DC is exactly 0 for real input).
    x_re0 = jnp.where(is_dc, 0.0, x_re)
    p = x_re0 * x_re0 + x_im * x_im                  # |FFT(x - mean)|^2 per bin

    # layer-norm variance via Parseval: var = sum_k p_k / C^2, broadcast over
    # each group's lanes by the block-diagonal ones/C^2 matrix (2nd MXU matmul).
    var = jnp.dot(p, mvar_ref[...], preferred_element_type=jnp.float32)  # (TM, L)
    s2 = 1.0 / (var + eps)                           # == rsqrt(var+eps)^2

    # biased residual spectrum: FFT(x - w0*mean) = FFT(x), DC bin scaled (1-w0)
    br_re = jnp.where(is_dc, (1.0 - w0) * x_re, x_re)
    a = _replace_denormals(br_re, denorm_th)         # phase uses guarded Re
    b = x_im
    den = a * a + b * b                              # |FFT(biased_residual)|^2

    # amplitude^2 of FFT(layer_norm(x)) = s^2 * p, denormal-guarded
    num = _replace_denormals(s2 * p, denorm_th)

    # cos/sin(atan2(b, a)) * amp == (a, b) * sqrt(num/den); /sqrt(2) = compose()
    scale = lax.rsqrt(den / num) * inv_sqrt2
    xr = a * scale
    xi = b * scale

    # irfft(n=C, norm='ortho') with gamma (ln weight) folded into the basis
    # columns: one (TM, 2L) x (2L, L) MXU matmul.  Rows k > C//2 of the basis
    # are zero; DC/Nyquist imag parts drop because sin(0)=sin(pi*t)=0.
    y = jnp.dot(jnp.concatenate([xr, xi], axis=-1), inv_ref[...],
                preferred_element_type=jnp.float32)
    o_ref[...] = y + beta_ref[...]


def swin_cc_forward(x, ln_weight, ln_bias, weight_, eps=1e-5, tile_rows=512):
    B, N, C = x.shape
    rows = B * N
    x2 = x.reshape(rows, C).astype(jnp.float32)

    # Lane-pack G consecutive rows into one 128-wide lane group for small C so
    # stores are unmasked and the MXU runs with K/N >= 128.
    if C < 128 and 128 % C == 0:
        G = 128 // C
    else:
        G = 1
    L = G * C

    packed_rows = _round_up(rows, G) // G
    tm = min(int(tile_rows), _round_up(packed_rows, 8))
    if _round_up(packed_rows, tm) // tm < 2 and tm >= 16:
        tm = _round_up((tm + 1) // 2, 8)      # keep >=2 grid steps (v7x megacore)
    grid_m = _round_up(packed_rows, tm) // tm
    rows_pad = grid_m * tm * G

    if rows_pad != rows:
        x2 = jnp.pad(x2, ((0, rows_pad - rows), (0, 0)))
    xp = x2.reshape(rows_pad // G, L)

    # tiny parameter softmax is host glue (weight_ = zeros -> [0.5, 0.5])
    w0 = jax.nn.softmax(weight_.astype(jnp.float32) / 1e-6, axis=0)[:1]   # (1,)

    # ---------------- host-side basis construction -------------------------
    idx = jnp.arange(C, dtype=jnp.float32)
    ang = 2.0 * math.pi * jnp.outer(idx, idx) / C          # (C, C), symmetric
    fcos = jnp.cos(ang)
    fsin = -jnp.sin(ang)
    eye_g = jnp.eye(G, dtype=jnp.float32)

    # forward DFT basis: block-diagonal per packed group, [cos | -sin]
    fwd = jnp.concatenate([jnp.kron(eye_g, fcos),
                           jnp.kron(eye_g, fsin)], axis=1)  # (L, 2L)

    # Parseval variance reducer: per-group sum / C^2, broadcast over the group
    mvar = jnp.kron(eye_g, jnp.full((C, C), 1.0 / (C * C), jnp.float32))  # (L, L)

    # inverse (irfft, ortho) basis with Hermitian weights, gamma folded in.
    kk = jnp.arange(C)
    if C % 2 == 0:
        wk = jnp.where(kk == 0, 1.0,
             jnp.where(kk == C // 2, 1.0,
             jnp.where(kk < C // 2, 2.0, 0.0)))
    else:
        wk = jnp.where(kk == 0, 1.0, jnp.where(kk <= (C - 1) // 2, 2.0, 0.0))
    # TODO(synk): for large C (>=256) trim bases to the C//2+1 Hermitian bins
    # (and single-buffer them) instead of carrying zero rows.
    inv_scale = 1.0 / math.sqrt(C)
    gamma = ln_weight.astype(jnp.float32).reshape(1, C)
    icos_g = (wk[:, None] * jnp.cos(ang)) * inv_scale * gamma
    isin_g = (wk[:, None] * jnp.sin(ang)) * inv_scale * gamma
    invb = jnp.concatenate([jnp.kron(eye_g, icos_g),
                            jnp.kron(eye_g, -isin_g)], axis=0)            # (2L, L)

    beta_p = jnp.tile(ln_bias.astype(jnp.float32).reshape(1, C), (1, G))  # (1, L)

    kernel = partial(_swin_cc_kernel, C=C, eps=float(eps),
                     inv_sqrt2=1.0 / math.sqrt(2.0), denorm_th=_DENORM_TH)

    out = pl.pallas_call(
        kernel,
        out_shape=jax.ShapeDtypeStruct((rows_pad // G, L), jnp.float32),
        grid=(grid_m,),
        in_specs=[
            pl.BlockSpec(memory_space=pltpu.MemorySpace.SMEM),   # w0 scalar
            pl.BlockSpec((tm, L), lambda i: (i, 0)),             # packed x rows
            pl.BlockSpec((L, 2 * L), lambda i: (0, 0)),          # forward DFT basis
            pl.BlockSpec((L, L), lambda i: (0, 0)),              # variance reducer
            pl.BlockSpec((2 * L, L), lambda i: (0, 0)),          # inverse basis (gamma folded)
            pl.BlockSpec((1, L), lambda i: (0, 0)),              # beta
        ],
        out_specs=pl.BlockSpec((tm, L), lambda i: (i, 0)),
        compiler_params=pltpu.CompilerParams(
            dimension_semantics=("parallel",),
            vmem_limit_bytes=64 * 1024 * 1024),
    )(w0, xp, fwd, mvar, invb, beta_p)

    out = out.reshape(rows_pad, C)[:rows]
    return out.reshape(B, N, C)


def swin_cc_reference(x, ln_weight, ln_bias, weight_, eps=1e-5):
    """Pure-JAX reference mirroring the PyTorch forward exactly."""
    x = x.astype(jnp.float32)
    mean = jnp.mean(x, axis=-1, keepdims=True)
    var = jnp.mean((x - mean) ** 2, axis=-1, keepdims=True)
    norm = (x - mean) / jnp.sqrt(var + eps)
    w = jax.nn.softmax(weight_.astype(jnp.float32) / 1e-6, axis=0)
    br = x - mean * w[0]
    fft_br = jnp.fft.fft(br, axis=-1)
    phase = jnp.arctan2(jnp.imag(fft_br), _replace_denormals(jnp.real(fft_br)))
    fft_nm = jnp.fft.fft(norm, axis=-1)
    amp = jnp.sqrt(_replace_denormals(jnp.real(fft_nm) ** 2 +
                                      jnp.imag(fft_nm) ** 2))
    z = (jnp.cos(phase) * amp + 1j * jnp.sin(phase) * amp) / math.sqrt(2.0)
    res = jnp.fft.irfft(z, n=z.shape[-1], axis=-1, norm='ortho')
    return res * ln_weight + ln_bias


if __name__ == "__main__":
    B, N, C = 2, 64, 32
    key = jax.random.PRNGKey(0)
    kx, kw, kb = jax.random.split(key, 3)

    x = jax.random.normal(kx, (B, N, C), dtype=jnp.float32)
    ln_weight = 1.0 + 0.1 * jax.random.normal(kw, (C,), dtype=jnp.float32)
    ln_bias = 0.1 * jax.random.normal(kb, (C,), dtype=jnp.float32)
    weight_ = jnp.zeros((2,), dtype=jnp.float32)   # nn.Parameter(torch.zeros(2))
    eps = 1e-5                                     # nn.LayerNorm default

    out = jax.block_until_ready(
        swin_cc_forward(x, ln_weight, ln_bias, weight_, eps=eps))
    ref = jax.block_until_ready(
        swin_cc_reference(x, ln_weight, ln_bias, weight_, eps=eps))

    if not jnp.allclose(out, ref, rtol=1e-3, atol=1e-3):
        max_err = float(jnp.max(jnp.abs(out - ref)))
        raise AssertionError(f"kernel mismatch, max abs err = {max_err}")

    print("KERNEL_OK")
</pallas_src>

<mosaic_0001>
module attributes {stable_mosaic.version = 11 : i64} {
  func.func @_swin_cc_kernel(%arg0: i32, %arg1: memref<1xf32, #tpu.memory_space<smem>>, %arg2: memref<16x128xf32, #tpu.memory_space<vmem>>, %arg3: memref<128x256xf32, #tpu.memory_space<vmem>>, %arg4: memref<128x128xf32, #tpu.memory_space<vmem>>, %arg5: memref<256x128xf32, #tpu.memory_space<vmem>>, %arg6: memref<1x128xf32, #tpu.memory_space<vmem>>, %arg7: memref<16x128xf32, #tpu.memory_space<vmem>>) attributes {dimension_semantics = [#tpu.dimension_semantics<parallel>], iteration_bounds = array<i64: 2>, scalar_prefetch = 0 : i64, scratch_operands = 0 : i64, tpu.core_type = #tpu.core_type<tc>, window_params = [{transform_indices = @transform_0, window_bounds = array<i64: 1>}, {transform_indices = @transform_1, window_bounds = array<i64: 16, 128>}, {pipeline_mode = #tpu.pipeline_mode<synchronous>, transform_indices = @transform_2, window_bounds = array<i64: 128, 256>}, {pipeline_mode = #tpu.pipeline_mode<synchronous>, transform_indices = @transform_3, window_bounds = array<i64: 128, 128>}, {pipeline_mode = #tpu.pipeline_mode<synchronous>, transform_indices = @transform_4, window_bounds = array<i64: 256, 128>}, {pipeline_mode = #tpu.pipeline_mode<synchronous>, transform_indices = @transform_5, window_bounds = array<i64: 1, 128>}, {transform_indices = @transform_6, window_bounds = array<i64: 16, 128>}]} {
    %c0 = arith.constant 0 : index
    %c0_0 = arith.constant 0 : index
    %0 = vector.load %arg2[%c0, %c0_0] : memref<16x128xf32, #tpu.memory_space<vmem>>, vector<16x128xf32>
    %c0_1 = arith.constant 0 : index
    %1 = memref.load %arg1[%c0_1] : memref<1xf32, #tpu.memory_space<smem>>
    %c0_2 = arith.constant 0 : index
    %c0_3 = arith.constant 0 : index
    %2 = vector.load %arg3[%c0_2, %c0_3] : memref<128x256xf32, #tpu.memory_space<vmem>>, vector<128x256xf32>
    %cst = arith.constant dense<0.000000e+00> : vector<16x256xf32>
    %3 = tpu.matmul %0, %2, %cst {dimension_numbers = #tpu.dot_dimension_numbers<[1], [0], [0], [1], [0, 0, 1, 1], [], []>} : vector<16x128xf32>, vector<128x256xf32>, vector<16x256xf32> -> vector<16x256xf32>
    %4 = vector.extract_strided_slice %3 {offsets = [0, 0], sizes = [16, 128], strides = [1, 1]} : vector<16x256xf32> to vector<16x128xf32>
    %5 = vector.extract_strided_slice %3 {offsets = [0, 128], sizes = [16, 128], strides = [1, 1]} : vector<16x256xf32> to vector<16x128xf32>
    %6 = tpu.iota {dimensions = array<i32: 1>} : vector<1x128xi32>
    %c32_i32 = arith.constant 32 : i32
    %c0_i32 = arith.constant 0 : i32
    %7 = arith.cmpi eq, %c32_i32, %c0_i32 : i32
    %c1_i32 = arith.constant 1 : i32
    %8 = arith.select %7, %c1_i32, %c32_i32 : i32
    %9 = vector.broadcast %8 : i32 to vector<1x128xi32>
    %10 = arith.remsi %6, %9 : vector<1x128xi32>
    %c0_i32_4 = arith.constant 0 : i32
    %11 = vector.broadcast %c0_i32_4 : i32 to vector<1x128xi32>
    %12 = arith.cmpi ne, %10, %11 : vector<1x128xi32>
    %c0_i32_5 = arith.constant 0 : i32
    %13 = vector.broadcast %c0_i32_5 : i32 to vector<1x128xi32>
    %14 = arith.cmpi slt, %10, %13 : vector<1x128xi32>
    %c0_i32_6 = arith.constant 0 : i32
    %15 = arith.cmpi slt, %8, %c0_i32_6 : i32
    %16 = vector.broadcast %15 : i1 to vector<1x128xi1>
    %17 = vector.broadcast %16 : vector<1x128xi1> to vector<1x128xi1>
    %18 = arith.xori %14, %17 : vector<1x128xi1>
    %19 = arith.andi %18, %12 : vector<1x128xi1>
    %20 = vector.broadcast %8 : i32 to vector<1x128xi32>
    %21 = arith.addi %10, %20 : vector<1x128xi32>
    %22 = arith.select %19, %21, %10 : vector<1x128xi1>, vector<1x128xi32>
    %c0_i32_7 = arith.constant 0 : i32
    %23 = vector.broadcast %c0_i32_7 : i32 to vector<1x128xi32>
    %24 = arith.cmpi eq, %22, %23 : vector<1x128xi32>
    %cst_8 = arith.constant 0.000000e+00 : f32
    %25 = vector.shape_cast %24 : vector<1x128xi1> to vector<1x128xi1>
    %26 = vector.broadcast %25 : vector<1x128xi1> to vector<16x128xi1>
    %27 = vector.broadcast %cst_8 : f32 to vector<16x128xf32>
    %28 = arith.select %26, %27, %4 : vector<16x128xi1>, vector<16x128xf32>
    %29 = arith.mulf %28, %28 : vector<16x128xf32>
    %30 = arith.mulf %5, %5 : vector<16x128xf32>
    %31 = arith.addf %29, %30 : vector<16x128xf32>
    %c0_9 = arith.constant 0 : index
    %c0_10 = arith.constant 0 : index
    %32 = vector.load %arg4[%c0_9, %c0_10] : memref<128x128xf32, #tpu.memory_space<vmem>>, vector<128x128xf32>
    %cst_11 = arith.constant dense<0.000000e+00> : vector<16x128xf32>
    %33 = tpu.matmul %31, %32, %cst_11 {dimension_numbers = #tpu.dot_dimension_numbers<[1], [0], [0], [1], [0, 0, 1, 1], [], []>} : vector<16x128xf32>, vector<128x128xf32>, vector<16x128xf32> -> vector<16x128xf32>
    %cst_12 = arith.constant 9.99999974E-6 : f32
    %34 = vector.broadcast %cst_12 : f32 to vector<16x128xf32>
    %35 = arith.addf %33, %34 : vector<16x128xf32>
    %cst_13 = arith.constant 1.000000e+00 : f32
    %36 = vector.broadcast %cst_13 : f32 to vector<16x128xf32>
    %37 = arith.divf %36, %35 : vector<16x128xf32>
    %cst_14 = arith.constant 1.000000e+00 : f32
    %38 = arith.subf %cst_14, %1 : f32
    %39 = vector.broadcast %38 : f32 to vector<16x128xf32>
    %40 = arith.mulf %39, %4 : vector<16x128xf32>
    %41 = vector.shape_cast %24 : vector<1x128xi1> to vector<1x128xi1>
    %42 = vector.broadcast %41 : vector<1x128xi1> to vector<16x128xi1>
    %43 = arith.select %42, %40, %4 : vector<16x128xi1>, vector<16x128xf32>
    %cst_15 = arith.constant 9.99999974E-6 : f32
    %44 = vector.broadcast %cst_15 : f32 to vector<16x128xf32>
    %45 = arith.cmpf olt, %43, %44 : vector<16x128xf32>
    %cst_16 = arith.constant -9.99999974E-6 : f32
    %46 = vector.broadcast %cst_16 : f32 to vector<16x128xf32>
    %47 = arith.cmpf ogt, %43, %46 : vector<16x128xf32>
    %48 = arith.andi %45, %47 : vector<16x128xi1>
    %cst_17 = arith.constant 9.99999974E-6 : f32
    %49 = vector.broadcast %cst_17 : f32 to vector<16x128xf32>
    %50 = arith.select %48, %49, %43 : vector<16x128xi1>, vector<16x128xf32>
    %51 = arith.mulf %50, %50 : vector<16x128xf32>
    %52 = arith.mulf %5, %5 : vector<16x128xf32>
    %53 = arith.addf %51, %52 : vector<16x128xf32>
    %54 = arith.mulf %37, %31 : vector<16x128xf32>
    %cst_18 = arith.constant 9.99999974E-6 : f32
    %55 = vector.broadcast %cst_18 : f32 to vector<16x128xf32>
    %56 = arith.cmpf olt, %54, %55 : vector<16x128xf32>
    %cst_19 = arith.constant -9.99999974E-6 : f32
    %57 = vector.broadcast %cst_19 : f32 to vector<16x128xf32>
    %58 = arith.cmpf ogt, %54, %57 : vector<16x128xf32>
    %59 = arith.andi %56, %58 : vector<16x128xi1>
    %cst_20 = arith.constant 9.99999974E-6 : f32
    %60 = vector.broadcast %cst_20 : f32 to vector<16x128xf32>
    %61 = arith.select %59, %60, %54 : vector<16x128xi1>, vector<16x128xf32>
    %62 = arith.divf %53, %61 : vector<16x128xf32>
    %63 = math.rsqrt %62 : vector<16x128xf32>
    %cst_21 = arith.constant 0.707106769 : f32
    %64 = vector.broadcast %cst_21 : f32 to vector<16x128xf32>
    %65 = arith.mulf %63, %64 : vector<16x128xf32>
    %66 = arith.mulf %50, %65 : vector<16x128xf32>
    %67 = arith.mulf %5, %65 : vector<16x128xf32>
    %68 = tpu.concatenate %66, %67 in 1 : vector<16x128xf32>, vector<16x128xf32> -> vector<16x256xf32>
    %c0_22 = arith.constant 0 : index
    %c0_23 = arith.constant 0 : index
    %69 = vector.load %arg5[%c0_22, %c0_23] : memref<256x128xf32, #tpu.memory_space<vmem>>, vector<256x128xf32>
    %cst_24 = arith.constant dense<0.000000e+00> : vector<16x128xf32>
    %70 = tpu.matmul %68, %69, %cst_24 {dimension_numbers = #tpu.dot_dimension_numbers<[1], [0], [0], [1], [0, 0, 1, 1], [], []>} : vector<16x256xf32>, vector<256x128xf32>, vector<16x128xf32> -> vector<16x128xf32>
    %c0_25 = arith.constant 0 : index
    %c0_26 = arith.constant 0 : index
    %71 = vector.load %arg6[%c0_25, %c0_26] : memref<1x128xf32, #tpu.memory_space<vmem>>, vector<1x128xf32>
    %72 = vector.broadcast %71 : vector<1x128xf32> to vector<16x128xf32>
    %73 = arith.addf %70, %72 : vector<16x128xf32>
    %c0_27 = arith.constant 0 : index
    %c0_28 = arith.constant 0 : index
    %74 = vector.load %arg7[%c0_27, %c0_28] : memref<16x128xf32, #tpu.memory_space<vmem>>, vector<16x128xf32>
    tpu.vector_store %arg7[%c0_27, %c0_28], %73 {strides = array<i32>} : memref<16x128xf32, #tpu.memory_space<vmem>>, vector<16x128xf32>,
    return
  }
  func.func @transform_0(%arg0: i32) -> i32 {
    %c0_i32 = arith.constant 0 : i32
    %c0_i32_0 = arith.constant 0 : i32
    return %c0_i32 : i32
  }
  func.func @transform_1(%arg0: i32) -> (i32, i32) {
    %c0_i32 = arith.constant 0 : i32
    %c0_i32_0 = arith.constant 0 : i32
    return %arg0, %c0_i32 : i32, i32
  }
  func.func @transform_2(%arg0: i32) -> (i32, i32) {
    %c0_i32 = arith.constant 0 : i32
    %c0_i32_0 = arith.constant 0 : i32
    %c0_i32_1 = arith.constant 0 : i32
    return %c0_i32, %c0_i32_0 : i32, i32
  }
  func.func @transform_3(%arg0: i32) -> (i32, i32) {
    %c0_i32 = arith.constant 0 : i32
    %c0_i32_0 = arith.constant 0 : i32
    %c0_i32_1 = arith.constant 0 : i32
    return %c0_i32, %c0_i32_0 : i32, i32
  }
  func.func @transform_4(%arg0: i32) -> (i32, i32) {
    %c0_i32 = arith.constant 0 : i32
    %c0_i32_0 = arith.constant 0 : i32
    %c0_i32_1 = arith.constant 0 : i32
    return %c0_i32, %c0_i32_0 : i32, i32
  }
  func.func @transform_5(%arg0: i32) -> (i32, i32) {
    %c0_i32 = arith.constant 0 : i32
    %c0_i32_0 = arith.constant 0 : i32
    %c0_i32_1 = arith.constant 0 : i32
    return %c0_i32, %c0_i32_0 : i32, i32
  }
  func.func @transform_6(%arg0: i32) -> (i32, i32) {
    %c0_i32 = arith.constant 0 : i32
    %c0_i32_0 = arith.constant 0 : i32
    return %arg0, %c0_i32 : i32, i32
  }
}

</mosaic_0001>

<bundles_post_ra>
// kernel: tpu_custom_call.1
= control target key start
LH: loop header
LB: loop body
LE: loop exit
PB: predicated region body
PF: predicated region fallthrough
CT: control target
= control target key end

     0   :  { %s1395_s0 = inlined_call_operand.<no memory space> [shape: f32[1], index: 0, kind: input, shape index: {}]   ;;  %s1396_s1 = inlined_call_operand.hbm [shape: f32[32,128], index: 1, kind: input, shape index: {}]   ;;  %s1397_s2 = inlined_call_operand.hbm [shape: f32[128,256], index: 2, kind: input, shape index: {}]   ;;  %s1398_s3 = inlined_call_operand.hbm [shape: f32[128,128], index: 3, kind: input, shape index: {}]   ;;  %s1399_s4 = inlined_call_operand.hbm [shape: f32[256,128], index: 4, kind: input, shape index: {}]   ;;  %s1400_s5 = inlined_call_operand.vmem [shape: f32[1,128], index: 5, kind: input, shape index: {}]   ;;  %s1401_s6 = inlined_call_operand.hbm [shape: f32[32,128], index: 6, kind: output, shape index: {}]  }
   0x1   :  { %11 = sst [smem:[#allocation2]] %s1395_s0 }
   0x2   :  { %12 = vsyncpa [#allocation4], 0 }
   0x3   :  { %14 = vsyncpa [#allocation4 + $0x1], 0 }
   0x4   :  { %15 = vsyncpa [#allocation7], 0 }
   0x5   :  { %16 = vsyncpa [#allocation10], 0 }
   0x6   :  { %17 = vsyncpa [#allocation5], 0 }
   0x7   :  { %19 = vsyncpa [#allocation5 + $0x1], 0  ;;  %s1163_s23 = smov 0   ;;  %s1165_s24 = smov 0  }
   0x8   :  { %s1167_s25 = smov 0   ;;  %s1169_s26 = smov 0  }
   0x9 LB: > { %s1184_s0 = sadd.s32 4294967295, %s1114_s26   ;;  %s786_s27 = sadd.s32 4294967294, %s1114_s26   ;;  %s1114_s26 = sphi %s1169_s26, %s1416_s26   ;;  %s1110_s25 = sphi %s1167_s25, %s1415_s25   ;;  %s1106_s24 = sphi %s1165_s24, %s1414_s24   ;;  %s1102_s23 = sphi %s1163_s23, %s1413_s23  }
   0xa   : > { %p66_p0 = scmp.ne.s32.totalorder %s1106_s24, %s1102_s23  ;;  %p67_p1 = scmp.eq.s32.totalorder %s1184_s0, 0 }
   0xb   : > { %p174_p2 = scmp.eq.s32.totalorder %s1184_s0, 1  ;;  %p180_p3 = scmp.eq.s32.totalorder %s786_s27, 1 }
   0xc   : > { %p1193_p4 = por %p67_p1, %p66_p0  ;;  %p787_p5 = scmp.ge.s32.totalorder %s1114_s26, 1 }
   0xd   : > { %p1198_p6 = por %p180_p3, %p66_p0  ;;  %p187_p7 = scmp.lt.s32.totalorder %s1114_s26, 3 }
   0xe   : > { %s201_s8 = sshll.u32 %s1397_s2, 4  ;;  %s1116_s10 = smov [#allocation6]   ;;  %s202_s8 = int_to_ptr.hbm [resolvable:$true] %s201_s8 }
   0xf   : > { %p1206_p8 = pnand %p787_p5, %p187_p7  ;;  %s203_s11 = sshll.u32 %s1116_s10, 4  ;;  %s204_s11 = int_to_ptr.vmem [resolvable:$true] %s203_s11 }
  0x10   : > { %s215_s15 = sshll.u32 %s1398_s3, 4  ;;  %s1117_s16 = smov 256   ;;  %s216_s15 = int_to_ptr.hbm [resolvable:$true] %s215_s15 }
  0x11   : > { %p840_p9 = pneg %p1206_p8  ;;  %s1118_s17 = smov 16  }
  0x12   : > { %s1119_s18 = smov [#allocation8]   ;;  %s1402_s20 = smov 128  }
  0x13   : > { %p1214_p10 = pnand %p840_p9, %p67_p1  ;;  %s217_s19 = sshll.u32 %s1119_s18, 4  ;;  %s218_s19 = int_to_ptr.vmem [resolvable:$true] %s217_s19 }
  0x14   : > { %s1121_s21 = smov 8   ;;  %s229_s30 = sshll.u32 %s1399_s4, 4  ;;  %s230_s30 = int_to_ptr.hbm [resolvable:$true] %s229_s30 }
  0x15   : > { %843 = dma.hbm_to_vmem [thread:$0]  (!%p1214_p10), %s202_s8, 4096, %s204_s11, [#allocation7], %s1117_s16, %s1117_s16, %s1118_s17  }
  0x16   : > { %846 = dma.hbm_to_vmem [thread:$0]  (!%p1214_p10), %s216_s15, 2048, %s218_s19, [#allocation7], %s1402_s20, %s1402_s20, %s1121_s21  }
  0x17   : > { %s1122_s7 = smov [#allocation9]   ;;  %s1238_s10 = sadd.s32 1, %s1114_s26  }
  0x18   : > { %s231_s8 = sshll.u32 %s1122_s7, 4  ;;  %s50_s11 = ssub.s32 %s1114_s26, %s1238_s10  ;;  %s232_s8 = int_to_ptr.vmem [resolvable:$true] %s231_s8 }
  0x19   : > { %849 = dma.hbm_to_vmem [thread:$0]  (!%p1214_p10), %s230_s30, 4096, %s232_s8, [#allocation10], %s1402_s20, %s1402_s20, %s1121_s21  }
  0x1a   : > { %s53_s13 = sadd.s32 1, %s1110_s25  ;;  %p51_p12 = scmp.eq.s32.totalorder %s50_s11, 0 }
  0x1b   : > { %p60_p13 = scmp.ne.s32.totalorder %s1110_s25, %s1106_s24  ;;  %p61_p0 = scmp.eq.s32.totalorder %s1114_s26, 0 }
  0x1c   : > { %s1247_s14 = scalar_select %p51_p12, %s1110_s25, %s53_s13  }
  0x1d   : > { %p1251_p3 = por %p174_p2, %p60_p13  ;;  %p861_p5 = scmp.lt.s32.totalorder %s1114_s26, 2 }
  0x1e   : > { %s248_s12 = sand.u32 1, %s1110_s25   ;;  %s806_s16 = sshll.u32 %s1114_s26, 4 }
  0x1f   : > { %p62_p7 = por %p61_p0, %p60_p13  ;;  %s792_s17 = sshll.u32 %s248_s12, 4 }
  0x20   : > { %s257_s22 = scalar_lea.hbm %s1396_s1, %s806_s16  ;;  %s252_s30 = scalar_lea.vmem [#allocation3], %s792_s17 }
  0x21   : > { %s258_s27 = sshll.u32 %s257_s22, 4  ;;  %s260_s7 = sshll.u32 %s252_s30, 4  ;;  %s259_s27 = int_to_ptr.hbm [resolvable:$true] %s258_s27  ;;  %s261_s7 = int_to_ptr.vmem [resolvable:$true] %s260_s7 }
  0x22   : > { %p1261_p9 = pnand %p861_p5, %p62_p7  ;;  %s249_s11 = scalar_lea.sflag [#allocation4], %s248_s12 }
  0x23   : > { %s1010_s13 = sshra.s32 %s259_s27, 4  ;;  %s1017_s17 = scalar_lea.hbm %s1396_s1, 32  ;;  %s1011_s13 = int_to_ptr.hbm [resolvable:$true] %s1010_s13 }
  0x24   : > { %s1012_s20 = scalar_lea.hbm %s1011_s13, 16  ;;  %p1014_p10 = pneg %p1261_p9 }
  0x25   : > { %p1013_p2 = scmp.ne.s32.totalorder %s1011_s13, %s1012_s20  ;;  %p1018_p0 = scmp.lt.s32.totalorder %s1011_s13, %s1396_s1 }
  0x26   : > { %p1019_p5 = scmp.lt.s32.totalorder %s1017_s17, %s1012_s20 }
  0x27   : > { %p1015_p12 = pnand %p1014_p10, %p1013_p2 }
  0x28   : > { %p1020_p7 = por %p1019_p5, %p1018_p0 }
  0x29   : > { %p1016_p13 = pneg %p1015_p12 }
  0x2b   : > { %p1021_p11 = pnand %p1020_p7, %p1016_p13 }
  0x2d   : > { %1024 = shalt.err (!%p1021_p11)
}
  0x2e   : > { %s1409_s12 = smov 128   ;;  %272 = sbr.rel (%p1206_p8) target bundleno = 564 (0x234), region = 44 }
  0x2f   : > { %853 = dma.hbm_to_vmem [thread:$0]  (!%p1261_p9), %s259_s27, 256, %s261_s7, %s249_s11, %s1409_s12, %s1409_s12, %s1121_s21  }
  0x30   : > { %s1281_s30 = sand.u32 (!%p1206_p8), 1, %s1106_s24  }
  0x31   : > { %s796_s20 = sshll.u32 (!%p1206_p8), %s1281_s30, 4  ;;  %s275_s13 = scalar_lea.sflag (!%p1206_p8), [#allocation4], %s1281_s30 }
  0x32   : > { %s1287_s16 = scalar_lea.vmem (!%p1206_p8), [#allocation3], %s796_s20 }
  0x33   : > { %1085 = dma.done.wait (%p1193_p4), %s275_s13, 256  }
  0x34   : > { %1087 = vsyncadd (%p1193_p4), %s275_s13, 4294967040 }
  0x35   : > { %1089 = dma.done.wait (%p67_p1), [#allocation7], 6144  }
  0x36   : > { %1091 = vsyncadd (%p67_p1), [#allocation7], 4294961152 }
  0x37   : > { %1093 = dma.done.wait (%p67_p1), [#allocation10], 4096  }
  0x38   : > { %1095 = vsyncadd (%p67_p1), [#allocation10], 4294963200  ;;  %v358_v0 = vld [vmem:[#allocation6 + $0xf0] sm:$0xff]  ;;  %v359_v1 = vld [vmem:[#allocation6 + $0xf8] sm:$0xff]  ;;  %s327_s28 = sld [smem:[#allocation2]]  ;;  %v406_v50 = vlaneseq  ;;  %s807_s7 = sshll.u32 %s1184_s0, 4 }
  0x39   : > { %v356_v2 = vld [vmem:[#allocation6 + $0xe0] sm:$0xff]  ;;  %360 = vmatpush.msra.mxu0 %v358_v0  ;;  %383 = vmatpush.msra.mxu1 %v359_v1  ;;  %v357_v3 = vld [vmem:[#allocation6 + $0xe8] sm:$0xff]  ;;  %v354_v4 = vld [vmem:[#allocation6 + $0xd0] sm:$0xff]  ;;  %s680_s18 = scalar_lea.hbm %s1401_s6, %s807_s7  ;;  %s322_s17 = scalar_lea.vmem [#allocation11], %s796_s20 }
  0x3a   : > { %v355_v5 = vld [vmem:[#allocation6 + $0xd8] sm:$0xff]  ;;  %v352_v6 = vld [vmem:[#allocation6 + $0xc0] sm:$0xff]  ;;  %v353_v7 = vld [vmem:[#allocation6 + $0xc8] sm:$0xff]  ;;  %v407_v51 = vand.u32 127, %v406_v50  ;;  %s681_s19 = sshll.u32 %s322_s17, 4  ;;  %s683_s22 = sshll.u32 %s680_s18, 4  ;;  %s682_s19 = int_to_ptr.vmem [resolvable:$true] %s681_s19  ;;  %s684_s22 = int_to_ptr.hbm [resolvable:$true] %s683_s22 }
  0x3b   : > { %361 = vmatpush.msra.mxu0 %v356_v2  ;;  %384 = vmatpush.msra.mxu1 %v357_v3  ;;  %v350_v8 = vld [vmem:[#allocation6 + $0xb0] sm:$0xff]  ;;  %v351_v9 = vld [vmem:[#allocation6 + $0xb8] sm:$0xff]  ;;  %v348_v10 = vld [vmem:[#allocation6 + $0xa0] sm:$0xff]  ;;  %s669_s0 = scalar_lea.sflag [#allocation5], %s1281_s30  ;;  %s1054_s12 = sshra.s32 %s684_s22, 4  ;;  %s1055_s12 = int_to_ptr.hbm [resolvable:$true] %s1054_s12 }
  0x3c   : > { %v349_v11 = vld [vmem:[#allocation6 + $0xa8] sm:$0xff]  ;;  %v346_v12 = vld [vmem:[#allocation6 + $0x90] sm:$0xff]  ;;  %v347_v13 = vld [vmem:[#allocation6 + $0x98] sm:$0xff]  ;;  %v412_v52 = vand.u32 31, %v407_v51  ;;  %s1056_s13 = scalar_lea.hbm %s1055_s12, 16  ;;  %p1061_p11 = scmp.lt.s32.totalorder %s1055_s12, %s1401_s6 }
  0x3d   : > { %362 = vmatpush.msra.mxu0 %v354_v4  ;;  %385 = vmatpush.msra.mxu1 %v355_v5  ;;  %v446_v14 = vld [vmem:[#allocation8 + $0x78] sm:$0xff]  ;;  %v445_v15 = vld [vmem:[#allocation8 + $0x70] sm:$0xff]  ;;  %v344_v16 = vld [vmem:[#allocation6 + $0x80] sm:$0xff]  ;;  %p1057_p1 = scmp.ne.s32.totalorder %s1055_s12, %s1056_s13 }
  0x3e   : > { %v345_v17 = vld [vmem:[#allocation6 + $0x88] sm:$0xff]  ;;  %447 = vmatpush.msra.mxu2 %v446_v14  ;;  %v342_v19 = vld [vmem:[#allocation6 + $0x70] sm:$0xff]  ;;  %v343_v20 = vld [vmem:[#allocation6 + $0x78] sm:$0xff]  ;;  %s500_s9 = ssub.f32 1.0, %s327_s28  ;;  %vm1303_vm0 = vcmp.eq.s32.totalorder %v412_v52, 0  ;;  %s1060_s28 = scalar_lea.hbm %s1401_s6, 32 }
  0x3f   : > { %363 = vmatpush.msra.mxu0 %v352_v6  ;;  %386 = vmatpush.msra.mxu1 %v353_v7  ;;  %v444_v18 = vld [vmem:[#allocation8 + $0x68] sm:$0xff]  ;;  %v443_v21 = vld [vmem:[#allocation8 + $0x60] sm:$0xff]  ;;  %v442_v24 = vld [vmem:[#allocation8 + $0x58] sm:$0xff]  ;;  %p1058_p4 = pnand %p1057_p1, %p1251_p3  ;;  %p1062_p9 = scmp.lt.s32.totalorder %s1060_s28, %s1056_s13 }
  0x40   : > { %448 = vmatpush.msra.mxu2 %v445_v15  ;;  %v340_v22 = vld [vmem:[#allocation6 + $0x60] sm:$0xff]  ;;  %v341_v23 = vld [vmem:[#allocation6 + $0x68] sm:$0xff]  ;;  %v338_v25 = vld [vmem:[#allocation6 + $0x50] sm:$0xff]  ;;  %v501_v54 = vstv %s500_s9 }
  0x41   : > { %364 = vmatpush.msra.mxu0 %v350_v8  ;;  %387 = vmatpush.msra.mxu1 %v351_v9  ;;  %v339_v26 = vld [vmem:[#allocation6 + $0x58] sm:$0xff]  ;;  %v441_v27 = vld [vmem:[#allocation8 + $0x50] sm:$0xff]  ;;  %v336_v28 = vld [vmem:[#allocation6 + $0x40] sm:$0xff]  ;;  %p1059_p8 = pneg %p1058_p4  ;;  %p1063_p2 = por %p1062_p9, %p1061_p11 }
  0x42   : > { %449 = vmatpush.msra.mxu2 %v444_v18  ;;  %v337_v29 = vld [vmem:[#allocation6 + $0x48] sm:$0xff]  ;;  %v334_v31 = vld [vmem:[#allocation6 + $0x30] sm:$0xff]  ;;  %v335_v32 = vld [vmem:[#allocation6 + $0x38] sm:$0xff] }
  0x43   : > { %365 = vmatpush.msra.mxu0 %v348_v10  ;;  %388 = vmatpush.msra.mxu1 %v349_v11  ;;  %v440_v30 = vld [vmem:[#allocation8 + $0x48] sm:$0xff]  ;;  %v439_v33 = vld [vmem:[#allocation8 + $0x40] sm:$0xff]  ;;  %v438_v36 = vld [vmem:[#allocation8 + $0x38] sm:$0xff]  ;;  %p1064_p10 = pnand %p1063_p2, %p1059_p8 }
  0x44   : > { %450 = vmatpush.msra.mxu2 %v443_v21  ;;  %v332_v34 = vld [vmem:[#allocation6 + $0x20] sm:$0xff]  ;;  %v333_v35 = vld [vmem:[#allocation6 + $0x28] sm:$0xff]  ;;  %v330_v37 = vld [vmem:[#allocation6 + $0x10] sm:$0xff] }
  0x45   : > { %366 = vmatpush.msra.mxu0 %v346_v12  ;;  %389 = vmatpush.msra.mxu1 %v347_v13  ;;  %v331_v38 = vld [vmem:[#allocation6 + $0x18] sm:$0xff]  ;;  %v437_v39 = vld [vmem:[#allocation8 + $0x30] sm:$0xff]  ;;  %v328_v40 = vld [vmem:[#allocation6] sm:$0xff] }
  0x46   : > { %451 = vmatpush.msra.mxu2 %v442_v24  ;;  %v329_v41 = vld [vmem:[#allocation6 + $0x8] sm:$0xff]  ;;  %v325_v42 = vld [vmem:[%s1287_s16] sm:$0xff]  ;;  %v434_v45 = vld [vmem:[#allocation8 + $0x18] sm:$0xff] }
  0x47   : > { %367 = vmatpush.msra.mxu0 %v344_v16  ;;  %390 = vmatpush.msra.mxu1 %v345_v17  ;;  %v436_v43 = vld [vmem:[#allocation8 + $0x28] sm:$0xff]  ;;  %v435_v44 = vld [vmem:[#allocation8 + $0x20] sm:$0xff]  ;;  %v433_v47 = vld [vmem:[#allocation8 + $0x10] sm:$0xff] }
  0x48   : > { %452 = vmatpush.msra.mxu2 %v441_v27  ;;  %v326_v46 = vld [vmem:[%s1287_s16 + $0x8] sm:$0xff]  ;;  %v431_v49 = vld [vmem:[#allocation8] sm:$0xff]  ;;  %v598_v15 = vld [vmem:[#allocation9 + $0x70] sm:$0xff] }
  0x49   : > { %368 = vmatpush.msra.mxu0 %v342_v19  ;;  %391 = vmatpush.msra.mxu1 %v343_v20  ;;  %v432_v48 = vld [vmem:[#allocation8 + $0x8] sm:$0xff]  ;;  %v599_v13 = vld [vmem:[#allocation9 + $0x78] sm:$0xff]  ;;  %v614_v16 = vld [vmem:[#allocation9 + $0xf0] sm:$0xff] }
  0x4a   : > { %453 = vmatpush.msra.mxu2 %v440_v30  ;;  %v615_v14 = vld [vmem:[#allocation9 + $0xf8] sm:$0xff]  ;;  %620 = vmatpush.msra.mxu3 %v599_v13  ;;  %v597_v17 = vld [vmem:[#allocation9 + $0x68] sm:$0xff]  ;;  %v596_v20 = vld [vmem:[#allocation9 + $0x60] sm:$0xff] }
  0x4b   : > { %369 = vmatpush.msra.mxu0 %v340_v22  ;;  %392 = vmatpush.msra.mxu1 %v341_v23  ;;  %v613_v18 = vld [vmem:[#allocation9 + $0xe8] sm:$0xff]  ;;  %v612_v21 = vld [vmem:[#allocation9 + $0xe0] sm:$0xff]  ;;  %v595_v23 = vld [vmem:[#allocation9 + $0x58] sm:$0xff] }
  0x4c   : > { %454 = vmatpush.msra.mxu2 %v439_v33  ;;  %621 = vmatpush.msra.mxu3 %v598_v15  ;;  %v611_v24 = vld [vmem:[#allocation9 + $0xd8] sm:$0xff]  ;;  %v593_v27 = vld [vmem:[#allocation9 + $0x48] sm:$0xff]  ;;  %v592_v30 = vld [vmem:[#allocation9 + $0x40] sm:$0xff] }
  0x4d   : > { %370 = vmatpush.msra.mxu0 %v338_v25  ;;  %393 = vmatpush.msra.mxu1 %v339_v26  ;;  %v594_v25 = vld [vmem:[#allocation9 + $0x50] sm:$0xff]  ;;  %v587_v52 = vld [vmem:[#allocation9 + $0x18] sm:$0xff] }
  0x4e   : > { %455 = vmatpush.msra.mxu2 %v438_v36  ;;  %622 = vmatpush.msra.mxu3 %v597_v17  ;;  %v610_v26 = vld [vmem:[#allocation9 + $0xd0] sm:$0xff]  ;;  %v607_v36 = vld [vmem:[#allocation9 + $0xb8] sm:$0xff] }
  0x4f   : > { %371 = vmatpush.msra.mxu0 %v336_v28  ;;  %394 = vmatpush.msra.mxu1 %v337_v29  ;;  %v609_v28 = vld [vmem:[#allocation9 + $0xc8] sm:$0xff]  ;;  %v603_v53 = vld [vmem:[#allocation9 + $0x98] sm:$0xff] }
  0x50   : > { %456 = vmatpush.msra.mxu2 %v437_v39  ;;  %623 = vmatpush.msra.mxu3 %v596_v20  ;;  %v606_v39 = vld [vmem:[#allocation9 + $0xb0] sm:$0xff] }
  0x51   : > { %372 = vmatpush.msra.mxu0 %v334_v31  ;;  %395 = vmatpush.msra.mxu1 %v335_v32  ;;  %v608_v31 = vld [vmem:[#allocation9 + $0xc0] sm:$0xff] }
  0x52   : > { %457 = vmatpush.msra.mxu2 %v436_v43  ;;  %624 = vmatpush.msra.mxu3 %v595_v23  ;;  %v589_v43 = vld [vmem:[#allocation9 + $0x28] sm:$0xff] }
  0x53   : > { %373 = vmatpush.msra.mxu0 %v332_v34  ;;  %396 = vmatpush.msra.mxu1 %v333_v35  ;;  %v591_v35 = vld [vmem:[#allocation9 + $0x38] sm:$0xff] }
  0x54   : > { %458 = vmatpush.msra.mxu2 %v435_v44  ;;  %625 = vmatpush.msra.mxu3 %v594_v25  ;;  %v605_v44 = vld [vmem:[#allocation9 + $0xa8] sm:$0xff] }
  0x55   : > { %374 = vmatpush.msra.mxu0 %v330_v37  ;;  %397 = vmatpush.msra.mxu1 %v331_v38  ;;  %v590_v38 = vld [vmem:[#allocation9 + $0x30] sm:$0xff] }
  0x56   : > { %459 = vmatpush.msra.mxu2 %v434_v45  ;;  %626 = vmatpush.msra.mxu3 %v593_v27 }
  0x57   : > { %375 = vmatpush.msra.mxu0 %v328_v40  ;;  %398 = vmatpush.msra.mxu1 %v329_v41 }
  0x58   : > { %376 = vmatmul.f32.vlgmr.msra.gmra.mxu0 %v325_v42  ;;  %399 = vmatmul.f32.vlgmr.msra.gmra.mxu1 %v325_v42 }
  0x59   : > { %460 = vmatpush.msra.mxu2 %v433_v47  ;;  %643 = vmatpush.msrb.mxu0 %v615_v14  ;;  %v604_v47 = vld [vmem:[#allocation9 + $0xa0] sm:$0xff] }
  0x5a   : > { %808 = vmatpush.msrb.mxu1 %v615_v14  ;;  %627 = vmatpush.msra.mxu3 %v592_v30 }
  0x5b   : > { %461 = vmatpush.msra.mxu2 %v432_v48  ;;  %644 = vmatpush.msrb.mxu0 %v614_v16 }
  0x5c   : > { %809 = vmatpush.msrb.mxu1 %v614_v16  ;;  %628 = vmatpush.msra.mxu3 %v591_v35 }
  0x5d   : > { %462 = vmatpush.msra.mxu2 %v431_v49  ;;  %645 = vmatpush.msrb.mxu0 %v613_v18 }
  0x5e   : > { %810 = vmatpush.msrb.mxu1 %v613_v18  ;;  %629 = vmatpush.msra.mxu3 %v590_v38 }
  0x5f   : > { %646 = vmatpush.msrb.mxu0 %v612_v21 }
  0x60   : > { %379 = vmatmul.f32.gmra.mxu0 %v326_v46  ;;  %402 = vmatmul.f32.gmra.mxu1 %v326_v46  ;;  %v588_v46 = vld [vmem:[#allocation9 + $0x20] sm:$0xff] }
  0x61   : > { %811 = vmatpush.msrb.mxu1 %v612_v21  ;;  %647 = vmatpush.msrb.mxu0 %v611_v24 }
  0x62   : > { %630 = vmatpush.msra.mxu3 %v589_v43 }
  0x63   : > { %812 = vmatpush.msrb.mxu1 %v611_v24  ;;  %648 = vmatpush.msrb.mxu0 %v610_v26 }
  0x64   : > { %631 = vmatpush.msra.mxu3 %v588_v46 }
  0x65   : > { %813 = vmatpush.msrb.mxu1 %v610_v26  ;;  %649 = vmatpush.msrb.mxu0 %v609_v28 }
  0x66   : > { %632 = vmatpush.msra.mxu3 %v587_v52 }
  0x67   : > { %814 = vmatpush.msrb.mxu1 %v609_v28  ;;  %650 = vmatpush.msrb.mxu0 %v608_v31 }
  0x69   : > { %815 = vmatpush.msrb.mxu1 %v608_v31  ;;  %651 = vmatpush.msrb.mxu0 %v607_v36 }
  0x6b   : > { %816 = vmatpush.msrb.mxu1 %v607_v36  ;;  %652 = vmatpush.msrb.mxu0 %v606_v39 }
  0x6d   : > { %817 = vmatpush.msrb.mxu1 %v606_v39  ;;  %653 = vmatpush.msrb.mxu0 %v605_v44 }
  0x6f   : > { %818 = vmatpush.msrb.mxu1 %v605_v44  ;;  %654 = vmatpush.msrb.mxu0 %v604_v47 }
  0x71   : > { %819 = vmatpush.msrb.mxu1 %v604_v47  ;;  %655 = vmatpush.msrb.mxu0 %v603_v53 }
  0x73   : > { %820 = vmatpush.msrb.mxu1 %v603_v53 }
  0xd5   : > { %v377_v55 = vpop.f32.mrf.mxu0  ;;  %v1307_v56 = vpop.f32.mrf.mxu1 }
  0xd6   : > { %v423_v57 = vsel %vm1303_vm0, 0.0, %v377_v55  ;;  %v502_v58 = vmul.f32 %v501_v54, %v377_v55  ;;  %v427_v59 = vmul.f32 %v1307_v56, %v1307_v56 }
  0xd7   : > { %v425_v60 = vmul.f32 %v423_v57, %v423_v57 }
  0xd8   : > { %v504_v61 = vsel %vm1303_vm0, %v502_v58, %v377_v55  ;;  %v586_v58 = vld [vmem:[#allocation9 + $0x10] sm:$0xff] }
  0xd9   : > { %v1315_v62 = vadd.f32 %v427_v59, %v425_v60  ;;  %vm506_vm1 = vcmp.lt.f32.partialorder %v504_v61, 1e-05  ;;  %vm508_vm2 = vcmp.gt.f32.partialorder %v504_v61, -1e-05  ;;  %633 = vmatpush.msra.mxu3 %v586_v58 }
  0xda   : > { %vm510_vm3 = vmand %vm506_vm1, %vm508_vm2 }
  0xdb   : > { %463 = vmatmul.f32.vlgmr.msra.gmra.mxu2 %v1315_v62  ;;  %v1318_v63 = vsel %vm510_vm3, 1e-05, %v504_v61 }
  0xdc   : > { %v514_v0 = vmul.f32 %v1318_v63, %v1318_v63 }
  0xdd   : > { %v380_v1 = vpop.f32.mrf.mxu0  ;;  %v1322_v2 = vpop.f32.mrf.mxu1 }
  0xde   : > { %v424_v3 = vsel %vm1303_vm0, 0.0, %v380_v1  ;;  %v503_v4 = vmul.f32 %v501_v54, %v380_v1  ;;  %v428_v5 = vmul.f32 %v1322_v2, %v1322_v2  ;;  %v1328_v6 = vadd.f32 %v514_v0, %v427_v59  ;;  %v602_v59 = vld [vmem:[#allocation9 + $0x90] sm:$0xff] }
  0xdf   : > { %v426_v7 = vmul.f32 %v424_v3, %v424_v3  ;;  %v601_v3 = vld [vmem:[#allocation9 + $0x88] sm:$0xff]  ;;  %656 = vmatpush.msrb.mxu0 %v602_v59  ;;  %821 = vmatpush.msrb.mxu1 %v602_v59 }
  0xe0   : > { %v505_v8 = vsel %vm1303_vm0, %v503_v4, %v380_v1  ;;  %v585_v1 = vld [vmem:[#allocation9 + $0x8] sm:$0xff]  ;;  %v584_v4 = vld [vmem:[#allocation9] sm:$0xff] }
  0xe1   : > { %v1332_v9 = vadd.f32 %v428_v5, %v426_v7  ;;  %vm507_vm4 = vcmp.lt.f32.partialorder %v505_v8, 1e-05  ;;  %vm509_vm5 = vcmp.gt.f32.partialorder %v505_v8, -1e-05  ;;  %634 = vmatpush.msra.mxu3 %v585_v1  ;;  %657 = vmatpush.msrb.mxu0 %v601_v3 }
  0xe2   : > { %vm511_vm6 = vmand %vm507_vm4, %vm509_vm5  ;;  %822 = vmatpush.msrb.mxu1 %v601_v3 }
  0xe3   : > { %466 = vmatmul.f32.gmra.mxu2 %v1332_v9  ;;  %v1335_v10 = vsel %vm511_vm6, 1e-05, %v505_v8  ;;  %635 = vmatpush.msra.mxu3 %v584_v4 }
  0xe4   : > { %v515_v11 = vmul.f32 %v1335_v10, %v1335_v10 }
  0xe6   : > { %v1339_v12 = vadd.f32 %v515_v11, %v428_v5  ;;  %v600_v5 = vld [vmem:[#allocation9 + $0x80] sm:$0xff] }
  0xe7   : > { %658 = vmatpush.msrb.mxu0 %v600_v5  ;;  %823 = vmatpush.msrb.mxu1 %v600_v5 }
 0x15e   : > { %v464_v19 = vpop.f32.mrf.mxu2 }
 0x15f   : > { %v465_v22 = vadd.f32 1e-05, %v464_v19 }
 0x161   : > { %908 = vrcp.f32 %v465_v22  ;;  %v481_v40 = vand.u32 2147483648, %v465_v22  ;;  %v479_v42 = vand.u32 2147483647, %v465_v22  ;;  %vm475_vm8 = vweird.f32 %v465_v22 }
 0x163   : > { %v482_v49 = vor.u32 1.1754944e-38, %v481_v40  ;;  %vm480_vm10 = vcmp.eq.f32.partialorder %v479_v42, 8.507059e+37 }
 0x166   : > { %v467_v29 = vpop.f32.mrf.mxu2 }
 0x167   : > { %v909_v32 = vpop.eup %908  ;;  %v1341_v33 = vadd.f32 1e-05, %v467_v29 }
 0x168   : > { %v471_v34 = vmul.f32 %v909_v32, %v465_v22  ;;  %vm476_vm7 = vweird.f32 %v909_v32 }
 0x169   : > { %910 = vrcp.f32 %v1341_v33  ;;  %vm477_vm9 = vmor %vm475_vm8, %vm476_vm7  ;;  %v494_v60 = vand.u32 2147483647, %v1341_v33  ;;  %v496_v61 = vand.u32 2147483648, %v1341_v33  ;;  %vm490_vm15 = vweird.f32 %v1341_v33 }
 0x16a   : > { %v472_v37 = vsub.f32 1.0, %v471_v34 }
 0x16b   : > { %v497_v8 = vor.u32 1.1754944e-38, %v496_v61  ;;  %vm495_vm1 = vcmp.eq.f32.partialorder %v494_v60, 8.507059e+37 }
 0x16c   : > { %v473_v41 = vmul.f32 %v909_v32, %v472_v37 }
 0x16e   : > { %v474_v45 = vadd.f32 %v909_v32, %v473_v41 }
 0x16f   : > { %v911_v48 = vpop.eup %910 }
 0x170   : > { %v478_v50 = vsel %vm477_vm9, %v909_v32, %v474_v45  ;;  %v486_v51 = vmul.f32 %v911_v48, %v1341_v33  ;;  %vm491_vm11 = vweird.f32 %v911_v48 }
 0x171   : > { %v483_v54 = vsel %vm480_vm10, %v482_v49, %v478_v50  ;;  %vm492_vm0 = vmor %vm490_vm15, %vm491_vm11 }
 0x172   : > { %v518_v55 = vmul.f32 %v483_v54, %v1315_v62  ;;  %v487_v57 = vsub.f32 1.0, %v486_v51 }
 0x174   : > { %v488_v0 = vmul.f32 %v911_v48, %v487_v57  ;;  %vm520_vm12 = vcmp.lt.f32.partialorder %v518_v55, 1e-05  ;;  %vm522_vm13 = vcmp.gt.f32.partialorder %v518_v55, -1e-05 }
 0x175   : > { %vm524_vm14 = vmand %vm520_vm12, %vm522_vm13 }
 0x176   : > { %v489_v62 = vadd.f32 %v911_v48, %v488_v0  ;;  %v526_v7 = vsel %vm524_vm14, 1e-05, %v518_v55 }
 0x177   : > { %912 = vrcp.f32 %v526_v7  ;;  %v539_v19 = vand.u32 2147483648, %v526_v7  ;;  %v537_v21 = vand.u32 2147483647, %v526_v7  ;;  %vm533_vm6 = vweird.f32 %v526_v7 }
 0x178   : > { %v493_v11 = vsel %vm492_vm0, %v911_v48, %v489_v62 }
 0x179   : > { %v498_v13 = vsel %vm495_vm1, %v497_v8, %v493_v11  ;;  %v540_v24 = vor.u32 1.1754944e-38, %v539_v19  ;;  %vm538_vm8 = vcmp.eq.f32.partialorder %v537_v21, 8.507059e+37 }
 0x17a   : > { %v519_v14 = vmul.f32 %v498_v13, %v1332_v9 }
 0x17c   : > { %vm521_vm2 = vcmp.lt.f32.partialorder %v519_v14, 1e-05  ;;  %vm523_vm3 = vcmp.gt.f32.partialorder %v519_v14, -1e-05 }
 0x17d   : > { %v913_v15 = vpop.eup %912  ;;  %vm525_vm4 = vmand %vm521_vm2, %vm523_vm3 }
 0x17e   : > { %v529_v16 = vmul.f32 %v913_v15, %v526_v7  ;;  %v527_v17 = vsel %vm525_vm4, 1e-05, %v519_v14  ;;  %vm534_vm5 = vweird.f32 %v913_v15 }
 0x17f   : > { %914 = vrcp.f32 %v527_v17  ;;  %vm535_vm7 = vmor %vm533_vm6, %vm534_vm5  ;;  %v554_v29 = vand.u32 2147483648, %v527_v17  ;;  %v552_v31 = vand.u32 2147483647, %v527_v17  ;;  %vm548_vm10 = vweird.f32 %v527_v17 }
 0x180   : > { %v530_v18 = vsub.f32 1.0, %v529_v16 }
 0x181   : > { %v555_v33 = vor.u32 1.1754944e-38, %v554_v29  ;;  %vm553_vm12 = vcmp.eq.f32.partialorder %v552_v31, 8.507059e+37 }
 0x182   : > { %v531_v20 = vmul.f32 %v913_v15, %v530_v18 }
 0x184   : > { %v532_v22 = vadd.f32 %v913_v15, %v531_v20 }
 0x185   : > { %v915_v23 = vpop.eup %914 }
 0x186   : > { %v536_v25 = vsel %vm535_vm7, %v913_v15, %v532_v22  ;;  %v544_v9 = vmul.f32 %v915_v23, %v527_v17  ;;  %vm549_vm9 = vweird.f32 %v915_v23 }
 0x187   : > { %v541_v26 = vsel %vm538_vm8, %v540_v24, %v536_v25  ;;  %vm550_vm11 = vmor %vm548_vm10, %vm549_vm9 }
 0x188   : > { %v542_v27 = vmul.f32 %v541_v26, %v1328_v6  ;;  %v545_v28 = vsub.f32 1.0, %v544_v9 }
 0x18a   : > { %916 = vrsqrt.f32 %v542_v27  ;;  %v546_v30 = vmul.f32 %v915_v23, %v545_v28  ;;  %vm564_vm14 = vweird.f32 %v542_v27 }
 0x18c   : > { %v547_v32 = vadd.f32 %v915_v23, %v546_v30 }
 0x18e   : > { %v551_v34 = vsel %vm550_vm11, %v915_v23, %v547_v32 }
 0x18f   : > { %v556_v35 = vsel %vm553_vm12, %v555_v33, %v551_v34 }
 0x190   : > { %v917_v36 = vpop.eup %916  ;;  %v557_v37 = vmul.f32 %v556_v35, %v1339_v12 }
 0x191   : > { %v559_v38 = vmul.f32 %v917_v36, %v542_v27  ;;  %vm565_vm13 = vweird.f32 %v917_v36 }
 0x192   : > { %918 = vrsqrt.f32 %v557_v37  ;;  %vm566_vm15 = vmor %vm564_vm14, %vm565_vm13  ;;  %vm574_vm1 = vweird.f32 %v557_v37 }
 0x193   : > { %v560_v39 = vmul.f32 %v917_v36, %v559_v38 }
 0x195   : > { %v561_v6 = vmul.f32 0.5, %v560_v39 }
 0x197   : > { %v562_v40 = vsub.f32 1.5, %v561_v6 }
 0x198   : > { %v919_v41 = vpop.eup %918 }
 0x199   : > { %v563_v42 = vmul.f32 %v917_v36, %v562_v40  ;;  %v569_v43 = vmul.f32 %v919_v41, %v557_v37  ;;  %vm575_vm0 = vweird.f32 %v919_v41 }
 0x19a   : > { %vm576_vm2 = vmor %vm574_vm1, %vm575_vm0 }
 0x19b   : > { %v567_v44 = vsel %vm566_vm15, %v917_v36, %v563_v42  ;;  %v570_v45 = vmul.f32 %v919_v41, %v569_v43 }
 0x19c   : > { %v578_v46 = vmul.f32 0.70710677, %v567_v44 }
 0x19d   : > { %v571_v47 = vmul.f32 0.5, %v570_v45 }
 0x19e   : > { %v580_v48 = vmul.f32 %v578_v46, %v1318_v63  ;;  %v582_v49 = vmul.f32 %v578_v46, %v1307_v56  ;;  %v907_v56 = vld [vmem:[%s1400_s5] ss:$0 sm:$0xff] }
 0x19f   : > { %v572_v12 = vsub.f32 1.5, %v571_v47 }
 0x1a0   : > { %636 = vmatmul.f32.vlgmr.msra.gmra.mxu3 %v580_v48  ;;  %659 = vmatmul.f32.vlgmr.msrb.gmra.mxu0 %v582_v49 }
 0x1a1   : > { %v573_v50 = vmul.f32 %v919_v41, %v572_v12 }
 0x1a3   : > { %v577_v51 = vsel %vm576_vm2, %v919_v41, %v573_v50 }
 0x1a4   : > { %v579_v52 = vmul.f32 0.70710677, %v577_v51 }
 0x1a6   : > { %v581_v53 = vmul.f32 %v579_v52, %v1335_v10  ;;  %v583_v54 = vmul.f32 %v579_v52, %v1322_v2 }
 0x1a8   : > { %639 = vmatmul.f32.gmra.mxu3 %v581_v53  ;;  %662 = vmatmul.f32.vlgmr.msrb.gmra.mxu1 %v583_v54 }
 0x21d   : > { %v660_v57 = vpop.f32.mrf.mxu0 }
 0x223   : > { %v637_v63 = vpop.f32.mrf.mxu3 }
 0x224   : > { %v638_v55 = vadd.f32 %v907_v56, %v637_v63 }
 0x225   : > { %v663_v59 = vpop.f32.mrf.mxu1 }
 0x226   : > { %v661_v58 = vadd.f32 %v660_v57, %v638_v55 }
 0x228   : > { %666 = vst [vmem:[%s322_s17] sm:$0xff] %v661_v58 }
 0x22b   : > { %v640_v2 = vpop.f32.mrf.mxu3 }
 0x22c   : > { %v641_v10 = vadd.f32 %v907_v56, %v640_v2 }
 0x22e   : > { %v664_v60 = vadd.f32 %v663_v59, %v641_v10 }
 0x230   : > { %667 = vst [vmem:[%s322_s17 + $0x8] sm:$0xff] %v664_v60 }
 0x231   : > { %1067 = shalt.err (!%p1064_p10)
}
 0x232   : > { %s1123_s30 = smov 128   ;;  %s1124_s27 = smov 8  }
 0x233   : > { %838 = dma.vmem_to_hbm [thread:$0]  (%p1251_p3), %s682_s19, 256, %s684_s22, %s669_s0, %s1123_s30, %s1123_s30, %s1124_s27  }
 0x234 PF: > { %s698_s7 = sand.u32 1, %s1102_s23   ;;  %p1412_p12 = scmp.ge.s32.totalorder %s1114_s26, 2 }
 0x235   : > { %s699_s8 = scalar_lea.sflag [#allocation5], %s698_s7 }
 0x236   : > { %p855_p13 = pnand %p1412_p12, %p1198_p6 }
 0x238   : > { %p856_p0 = pneg %p855_p13 }
 0x23a   : > { %1097 = dma.done.wait (%p856_p0), %s699_s8, 256  }
 0x23b   : > { %1099 = vsyncadd (%p856_p0), %s699_s8, 4294967040  ;;  %p22_p5 = scmp.ge.s32.totalorder %s1238_s10, 4   ;;  %s1413_s23 = smov %s1106_s24 }
 0x23c   : > { %s1414_s24 = smov %s1110_s25  ;;  %s1415_s25 = smov %s1247_s14 }
 0x23d   : > { %s1416_s26 = smov %s1238_s10  ;;  %24 = sbr.rel (!%p22_p5) target bundleno = 9 (0x9), region = 101 }
 0x242   :  { %705 = vsyncpa [#allocation4], 1 }
 0x243   :  { %707 = vsyncpa [#allocation4 + $0x1], 1 }
 0x244   :  { %708 = vsyncpa [#allocation7], 1 }
 0x245   :  { %709 = vsyncpa [#allocation10], 1 }
 0x246   :  { %710 = vsyncpa [#allocation5], 1 }
 0x247   :  { %712 = vsyncpa [#allocation5 + $0x1], 1 }

</bundles_post_ra>
